<compile_context>
chip_gen: v6e
topology: v6e:2x2x1
jax: 0.10.0
libtpu: 0.0.40
codegen_flags: <defaults>
</compile_context>

<pallas_src>
import functools

import jax
import jax.numpy as jnp
from jax.experimental import pallas as pl
from jax.experimental.pallas import tpu as pltpu


def _round_up(x, m):
    return ((x + m - 1) // m) * m


def _cdiv(a, b):
    return -(-a // b)


def meta_nn_kernel(x_ref, w1_ref, b1_ref, w2_ref, b2_ref, o_ref):
    # fc1: (TB, I) @ (I, H) -> f32 accumulator on the MXU
    h = jnp.dot(x_ref[...], w1_ref[...], preferred_element_type=jnp.float32)
    # bias + ReLU in f32 on the VPU
    h = jnp.maximum(h + b1_ref[...], 0.0)
    # fc2: (TB, H) @ (H, C) -> f32 accumulator
    out = jnp.dot(h.astype(w2_ref.dtype), w2_ref[...],
                  preferred_element_type=jnp.float32)
    out = out + b2_ref[...]
    o_ref[...] = out.astype(o_ref.dtype)


@functools.partial(jax.jit,
                   static_argnames=("block_b", "compute_dtype", "out_dtype"))
def meta_nn_forward(x, w1, b1, w2, b2, *, block_b=1024, compute_dtype=None,
                    out_dtype=None):
    """x: (B, I); w1: (I, H); b1: (H,); w2: (H, C); b2: (C,)."""
    B, I = x.shape
    H = w1.shape[1]
    C = w2.shape[1]
    if out_dtype is None:
        out_dtype = x.dtype  # captured before any compute_dtype cast

    # Optional low-precision matmul operands (bf16 recommended on v6e/v7x and
    # usable on v5e); accumulation stays f32 via preferred_element_type,
    # biases stay f32.
    if compute_dtype is not None:
        x = x.astype(compute_dtype)
        w1 = w1.astype(compute_dtype)
        w2 = w2.astype(compute_dtype)
    b1 = b1.astype(jnp.float32)
    b2 = b2.astype(jnp.float32)

    # ---- Batch tiling.  No wrapper padding: a cdiv grid lets Pallas mask the
    # ragged last block (garbage rows never reach the valid output region).
    num_tiles = max(1, _cdiv(B, block_b))
    if B >= 512:
        num_tiles = max(num_tiles, 2)        # keep both v7x TCs busy
    # Sublane-aligned tile; 4096-row cap keeps double-buffered x/out tiles
    # comfortably inside v5e's 16 MiB default scoped VMEM.
    tb = min(_round_up(_cdiv(B, num_tiles), 8), 4096)
    grid = (_cdiv(B, tb),)

    # ---- Class-dim handling.  For small C the masked vst is hidden under the
    # HBM-bound DMA, so keep the native width.  Only lane-pad when C is large
    # but misaligned (e.g. 1000 -> 1024).
    if C >= 128 and C % 128 != 0:
        c_out = _round_up(C, 128)
        w2 = jnp.pad(w2, ((0, 0), (0, c_out - C)))
        b2 = jnp.pad(b2, (0, c_out - C))
    else:
        c_out = C

    b1_2d = b1.reshape(1, H)
    b2_2d = b2.reshape(1, c_out)

    flops = 2 * B * I * H + 2 * B * H * c_out
    bytes_accessed = (x.size * x.dtype.itemsize
                      + w1.size * w1.dtype.itemsize
                      + w2.size * w2.dtype.itemsize
                      + (H + c_out) * 4
                      + B * c_out * jnp.dtype(out_dtype).itemsize)

    out = pl.pallas_call(
        meta_nn_kernel,
        out_shape=jax.ShapeDtypeStruct((B, c_out), out_dtype),
        grid=grid,
        in_specs=[
            # NOTE: (tb, I) is legal because I equals the full array dim; if
            # input_size is ever tiled it must become a multiple of 128.
            pl.BlockSpec((tb, I), lambda i: (i, 0)),       # x: tiled over batch
            pl.BlockSpec((I, H), lambda i: (0, 0)),        # W1: VMEM-resident
            pl.BlockSpec((1, H), lambda i: (0, 0)),        # b1: VMEM-resident
            pl.BlockSpec((H, c_out), lambda i: (0, 0)),    # W2: VMEM-resident
            pl.BlockSpec((1, c_out), lambda i: (0, 0)),    # b2: VMEM-resident
        ],
        out_specs=pl.BlockSpec((tb, c_out), lambda i: (i, 0)),
        compiler_params=pltpu.CompilerParams(
            dimension_semantics=("parallel",)),  # batch tiles shard over v7x's 2 TCs
        cost_estimate=pl.CostEstimate(flops=flops,
                                      transcendentals=0,
                                      bytes_accessed=bytes_accessed),
    )(x, w1, b1_2d, w2, b2_2d)

    return out[:, :C] if c_out != C else out


def init_params(key, input_size, hidden_size, num_classes, dtype=jnp.float32):
    """Deterministic init matching PyTorch nn.Linear default: U(-1/sqrt(fan_in), +1/sqrt(fan_in))."""
    k1, k2, k3, k4 = jax.random.split(key, 4)
    s1 = 1.0 / jnp.sqrt(jnp.array(input_size, dtype))
    s2 = 1.0 / jnp.sqrt(jnp.array(hidden_size, dtype))
    w1 = jax.random.uniform(k1, (input_size, hidden_size), dtype, -s1, s1)
    b1 = jax.random.uniform(k2, (hidden_size,), dtype, -s1, s1)
    w2 = jax.random.uniform(k3, (hidden_size, num_classes), dtype, -s2, s2)
    b2 = jax.random.uniform(k4, (num_classes,), dtype, -s2, s2)
    return w1, b1, w2, b2


if __name__ == "__main__":
    input_size, hidden_size, num_classes = 32, 32, 8

    key = jax.random.PRNGKey(0)
    kx, kp = jax.random.split(key)
    w1, b1, w2, b2 = init_params(kp, input_size, hidden_size, num_classes)

    # Small batch (single grid step), ragged batch (masked last block), and a
    # larger batch (>=2 parallel batch tiles, VMEM-resident weights).
    for batch in (8, 500, 512):
        xb = jax.random.normal(jax.random.fold_in(kx, batch),
                               (batch, input_size), jnp.float32)
        out = jax.block_until_ready(meta_nn_forward(xb, w1, b1, w2, b2))

        # Reference in plain JAX (same math as the PyTorch forward).
        ref = jnp.maximum(xb @ w1 + b1, 0.0) @ w2 + b2
        assert out.shape == (batch, num_classes)
        assert jnp.allclose(out, ref, atol=1e-5, rtol=1e-5)

    # bf16 operand path (recommended default on v6e/v7x): f32 accumulation via
    # preferred_element_type, looser tolerance from bf16 operand rounding.
    xb = jax.random.normal(jax.random.fold_in(kx, 1024),
                           (512, input_size), jnp.float32)
    out_bf16 = jax.block_until_ready(
        meta_nn_forward(xb, w1, b1, w2, b2, compute_dtype=jnp.bfloat16))
    ref = jnp.maximum(xb @ w1 + b1, 0.0) @ w2 + b2
    assert out_bf16.shape == (512, num_classes)
    assert jnp.allclose(out_bf16, ref, atol=2e-2, rtol=2e-2)

    print("KERNEL_OK")
</pallas_src>

<mosaic_0001>
module attributes {stable_mosaic.version = 11 : i64} {
  func.func @meta_nn_kernel(%arg0: i32, %arg1: memref<8x32xf32, #tpu.memory_space<vmem>>, %arg2: memref<32x32xf32, #tpu.memory_space<vmem>>, %arg3: memref<1x32xf32, #tpu.memory_space<vmem>>, %arg4: memref<32x8xf32, #tpu.memory_space<vmem>>, %arg5: memref<1x8xf32, #tpu.memory_space<vmem>>, %arg6: memref<8x8xf32, #tpu.memory_space<vmem>>) attributes {dimension_semantics = [#tpu.dimension_semantics<parallel>], iteration_bounds = array<i64: 1>, scalar_prefetch = 0 : i64, scratch_operands = 0 : i64, tpu.core_type = #tpu.core_type<tc>, window_params = [{transform_indices = @transform_0, window_bounds = array<i64: 8, 32>}, {pipeline_mode = #tpu.pipeline_mode<synchronous>, transform_indices = @transform_1, window_bounds = array<i64: 32, 32>}, {pipeline_mode = #tpu.pipeline_mode<synchronous>, transform_indices = @transform_2, window_bounds = array<i64: 1, 32>}, {pipeline_mode = #tpu.pipeline_mode<synchronous>, transform_indices = @transform_3, window_bounds = array<i64: 32, 8>}, {pipeline_mode = #tpu.pipeline_mode<synchronous>, transform_indices = @transform_4, window_bounds = array<i64: 1, 8>}, {transform_indices = @transform_5, window_bounds = array<i64: 8, 8>}]} {
    %c0 = arith.constant 0 : index
    %c0_0 = arith.constant 0 : index
    %0 = vector.load %arg1[%c0, %c0_0] : memref<8x32xf32, #tpu.memory_space<vmem>>, vector<8x32xf32>
    %c0_1 = arith.constant 0 : index
    %c0_2 = arith.constant 0 : index
    %1 = vector.load %arg2[%c0_1, %c0_2] : memref<32x32xf32, #tpu.memory_space<vmem>>, vector<32x32xf32>
    %cst = arith.constant dense<0.000000e+00> : vector<8x32xf32>
    %2 = tpu.matmul %0, %1, %cst {dimension_numbers = #tpu.dot_dimension_numbers<[1], [0], [0], [1], [0, 0, 1, 1], [], []>} : vector<8x32xf32>, vector<32x32xf32>, vector<8x32xf32> -> vector<8x32xf32>
    %c0_3 = arith.constant 0 : index
    %c0_4 = arith.constant 0 : index
    %3 = vector.load %arg3[%c0_3, %c0_4] : memref<1x32xf32, #tpu.memory_space<vmem>>, vector<1x32xf32>
    %4 = vector.broadcast %3 : vector<1x32xf32> to vector<8x32xf32>
    %5 = arith.addf %2, %4 : vector<8x32xf32>
    %cst_5 = arith.constant 0.000000e+00 : f32
    %6 = vector.broadcast %cst_5 : f32 to vector<8x32xf32>
    %7 = arith.maximumf %5, %6 : vector<8x32xf32>
    %c0_6 = arith.constant 0 : index
    %c0_7 = arith.constant 0 : index
    %8 = vector.load %arg4[%c0_6, %c0_7] : memref<32x8xf32, #tpu.memory_space<vmem>>, vector<32x8xf32>
    %cst_8 = arith.constant dense<0.000000e+00> : vector<8x8xf32>
    %9 = tpu.matmul %7, %8, %cst_8 {dimension_numbers = #tpu.dot_dimension_numbers<[1], [0], [0], [1], [0, 0, 1, 1], [], []>} : vector<8x32xf32>, vector<32x8xf32>, vector<8x8xf32> -> vector<8x8xf32>
    %c0_9 = arith.constant 0 : index
    %c0_10 = arith.constant 0 : index
    %10 = vector.load %arg5[%c0_9, %c0_10] : memref<1x8xf32, #tpu.memory_space<vmem>>, vector<1x8xf32>
    %11 = vector.broadcast %10 : vector<1x8xf32> to vector<8x8xf32>
    %12 = arith.addf %9, %11 : vector<8x8xf32>
    %c0_11 = arith.constant 0 : index
    %c0_12 = arith.constant 0 : index
    %13 = vector.load %arg6[%c0_11, %c0_12] : memref<8x8xf32, #tpu.memory_space<vmem>>, vector<8x8xf32>
    tpu.vector_store %arg6[%c0_11, %c0_12], %12 {strides = array<i32>} : memref<8x8xf32, #tpu.memory_space<vmem>>, vector<8x8xf32>,
    return
  }
  func.func @transform_0(%arg0: i32) -> (i32, i32) {
    %c0_i32 = arith.constant 0 : i32
    %c0_i32_0 = arith.constant 0 : i32
    return %arg0, %c0_i32 : i32, i32
  }
  func.func @transform_1(%arg0: i32) -> (i32, i32) {
    %c0_i32 = arith.constant 0 : i32
    %c0_i32_0 = arith.constant 0 : i32
    %c0_i32_1 = arith.constant 0 : i32
    return %c0_i32, %c0_i32_0 : i32, i32
  }
  func.func @transform_2(%arg0: i32) -> (i32, i32) {
    %c0_i32 = arith.constant 0 : i32
    %c0_i32_0 = arith.constant 0 : i32
    %c0_i32_1 = arith.constant 0 : i32
    return %c0_i32, %c0_i32_0 : i32, i32
  }
  func.func @transform_3(%arg0: i32) -> (i32, i32) {
    %c0_i32 = arith.constant 0 : i32
    %c0_i32_0 = arith.constant 0 : i32
    %c0_i32_1 = arith.constant 0 : i32
    return %c0_i32, %c0_i32_0 : i32, i32
  }
  func.func @transform_4(%arg0: i32) -> (i32, i32) {
    %c0_i32 = arith.constant 0 : i32
    %c0_i32_0 = arith.constant 0 : i32
    %c0_i32_1 = arith.constant 0 : i32
    return %c0_i32, %c0_i32_0 : i32, i32
  }
  func.func @transform_5(%arg0: i32) -> (i32, i32) {
    %c0_i32 = arith.constant 0 : i32
    %c0_i32_0 = arith.constant 0 : i32
    return %arg0, %c0_i32 : i32, i32
  }
}

</mosaic_0001>

<bundles_post_ra>
// kernel: meta_nn_forward.1
= control target key start
LH: loop header
LB: loop body
LE: loop exit
PB: predicated region body
PF: predicated region fallthrough
CT: control target
= control target key end

     0   :  { %v269_v1 = vmov 0.0   ;;  %vm270_vm0 = vmmov 0   ;;  %s340_s0 = inlined_call_operand.vmem [shape: f32[8,32], index: 0, kind: input, shape index: {}]   ;;  %s341_s1 = inlined_call_operand.vmem [shape: f32[32,32], index: 1, kind: input, shape index: {}]   ;;  %s342_s2 = inlined_call_operand.vmem [shape: f32[1,32], index: 2, kind: input, shape index: {}]   ;;  %s343_s3 = inlined_call_operand.vmem [shape: f32[32,8], index: 3, kind: input, shape index: {}]   ;;  %s344_s4 = inlined_call_operand.vmem [shape: f32[1,8], index: 4, kind: input, shape index: {}]   ;;  %s345_s5 = inlined_call_operand.hbm [shape: f32[8,8], index: 5, kind: output, shape index: {}]  }
   0x1   :  { %v25_v0 = vld [vmem:[%s341_s1 + $0x18] sm:$0xff]  ;;  %222 = vmatprep.subr.mxu0 %v269_v1  ;;  %v24_v2 = vld [vmem:[%s341_s1 + $0x10] sm:$0xff]  ;;  %230 = vmatprep.mubr.msk.f32.mxu0 %vm270_vm0, %v269_v1 }
   0x2   :  { %v111_v3 = vld [vmem:[%s343_s3 + $0x18] sm:$0xff]  ;;  %223 = vmatpush3.msra.mxu0 %v25_v0  ;;  %233 = vmatprep.subr.mxu1 %v269_v1 }
   0x3   :  { %10 = vsyncpa [#allocation3], 0  ;;  %224 = vmatprep.subr.mxu0 %v269_v1  ;;  %v23_v4 = vld [vmem:[%s341_s1 + $0x8] sm:$0xff]  ;;  %234 = vmatpush3.msra.mxu1 %v111_v3  ;;  %v22_v5 = vld [vmem:[%s341_s1] sm:$0xff]  ;;  %vm33_vm1 = vcmask 261120   ;;  %s271_s13 = smov [#allocation2]  }
   0x4   :  { %225 = vmatpush3.msra.mxu0 %v24_v2  ;;  %235 = vmatprep.subr.mxu1 %v269_v1  ;;  %v21_v6 = vld [vmem:[%s340_s0] sm:$0xff]  ;;  %v110_v7 = vld [vmem:[%s343_s3 + $0x10] sm:$0xff]  ;;  %v109_v8 = vld [vmem:[%s343_s3 + $0x8] sm:$0xff]  ;;  %s200_s14 = sshll.u32 %s271_s13, 4  ;;  %vm192_vm2 = vcmask 64512   ;;  %s201_s14 = int_to_ptr.vmem [resolvable:$true] %s200_s14 }
   0x5   :  { %226 = vmatprep.subr.mxu0 %v269_v1  ;;  %241 = vmatprep.mubr.msk.f32.mxu1 %vm270_vm0, %v269_v1  ;;  %v108_v9 = vld [vmem:[%s343_s3] sm:$0xff]  ;;  %s247_s3 = scalar_lea.vmem %s201_s14, 128  ;;  %p252_p1 = scmp.lt.s32.totalorder %s201_s14, %s201_s14 }
   0x6   :  { %227 = vmatpush3.msra.mxu0 %v23_v4  ;;  %236 = vmatpush3.msra.mxu1 %v110_v7  ;;  %v208_v10 = vld [vmem:[%s342_s2] ss:$0 sm:$0xff]  ;;  %p248_p0 = scmp.ne.s32.totalorder %s201_s14, %s247_s3  ;;  %p253_p2 = scmp.lt.s32.totalorder %s247_s3, %s247_s3 }
   0x7   :  { %228 = vmatprep.subr.mxu0 %v269_v1  ;;  %237 = vmatprep.subr.mxu1 %v269_v1  ;;  %v210_v15 = vld [vmem:[%s344_s4] ss:$0 sm:$0xff] }
   0x8   :  { %229 = vmatpush3.msra.mxu0 %v22_v5  ;;  %238 = vmatpush3.msra.mxu1 %v109_v8  ;;  %p254_p3 = por %p253_p2, %p252_p1 }
   0x9   :  { %231 = vmatmul.mubr.msk.f32.vlgmr.msra.gmra.mxu0 %vm33_vm1, %v21_v6  ;;  %239 = vmatprep.subr.mxu1 %v269_v1 }
   0xa   :  { %240 = vmatpush3.msra.mxu1 %v108_v9  ;;  %p255_p4 = pnand %p254_p3, %p248_p0 }
  0xc9   :  { %v103_v11 = vpop.f32.mrf.mxu0 }
  0xca   :  { %v104_v12 = vadd.f32 %v208_v10, %v103_v11 }
  0xcb   :  { %v232_v13 = vpop.f32.mrf.mxu0 }
  0xcc   :  { %v107_v14 = vmax.f32 %v104_v12, 0.0 }
  0xce   :  { %242 = vmatmul.mubr.msk.f32.vlgmr.msra.gmra.mxu1 %vm33_vm1, %v107_v14 }
 0x18e   :  { %v188_v16 = vpop.f32.mrf.mxu1 }
 0x18f   :  { %v189_v17 = vadd.f32 %v210_v15, %v188_v16 }
 0x190   :  { %v243_v18 = vpop.f32.mrf.mxu1 }
 0x191   :  { %193 = vst.msk [vmem:[#allocation2] sm:$0xff] %vm192_vm2, %v189_v17 }
 0x192   :  { %258 = shalt.err (!%p255_p4)
}
 0x193   :  { %203 = dma.vmem_to_hbm [thread:$0]  %s201_s14, 128, %s345_s5, [#allocation3]  }
 0x194   :  { %267 = dma.done.wait [#allocation3], 128  }
 0x195   :  { %268 = vsyncadd [#allocation3], 4294967168 }
 0x196   :  { %207 = vsyncpa [#allocation3], 1 }

</bundles_post_ra>
